<compile_context>
chip_gen: v6e
topology: v6e:2x2x1
jax: 0.10.0
libtpu: 0.0.40
codegen_flags: <defaults>
</compile_context>

<pallas_src>
import functools

import jax
import jax.numpy as jnp
from jax import lax
from jax.experimental import pallas as pl
from jax.experimental.pallas import tpu as pltpu

BN_EPS = 1e-5
TOTAL_EPOCHS = 240  # DynamicReLU(240)


def _rep_needle_kernel(a_ref,                      # (1, 1) SMEM: DynamicReLU slope
                       x_ref,                      # (N, Cin,  Lp) VMEM
                       w1_ref, g1_ref, b1_ref,     # (Cexp, Cin), (Cexp,1), (Cexp,1)
                       w2_ref, g2_ref, b2_ref,     # (Cexp, Cexp), (Cexp,1), (Cexp,1)
                       w3_ref, g3_ref, b3_ref,     # (Cout, Cexp), (Cout,1), (Cout,1)
                       o_ref,                      # (N, Cout, Lp) VMEM
                       *, n_samples, l_valid, l_padded, matmul_dtype):
    a = a_ref[0, 0]                                # DynamicReLU slope (traced scalar)
    inv_m = 1.0 / float(n_samples * l_valid)       # 1 / (batch elements per channel)

    need_mask = (l_valid != l_padded)              # trace-time Python branch
    if need_mask:
        lane = lax.broadcasted_iota(jnp.int32, (1, l_padded), 1)
        mask = (lane < l_valid).astype(jnp.float32)

    # Per-sample views of the input; padded lanes are exact zeros (wrapper pads).
    xs = [x_ref[n] for n in range(n_samples)]      # each (Cin, Lp)

    def layer(hs_in, w_ref, g_ref, b_ref, zero_pad_lanes):
        # 1x1 conv == per-sample (Cout, Cin) @ (Cin, Lp) on the MXU.
        w = w_ref[...].astype(matmul_dtype)
        hs = [jnp.dot(w, h.astype(matmul_dtype),
                      preferred_element_type=jnp.float32)
              for h in hs_in]

        # BatchNorm2d, training mode: biased batch stats per channel over all
        # samples and valid lanes.  Single pass (sum, sum-of-squares) in f32;
        # var clamped >= 0 against E[x^2]-mean^2 cancellation.
        # Inputs have zero padded lanes, so no mask is needed here.
        s = sum(jnp.sum(h, axis=-1, keepdims=True) for h in hs)
        ss = sum(jnp.sum(h * h, axis=-1, keepdims=True) for h in hs)
        mean = s * inv_m
        var = jnp.maximum(ss * inv_m - mean * mean, 0.0)

        # Fold BN affine into one per-channel scale/shift (cheap (C,1) math),
        # so the full-width work is a single mul+add per element.
        scale = g_ref[...] * lax.rsqrt(var + BN_EPS)
        shift = b_ref[...] - mean * scale

        outs = []
        for h in hs:
            y = h * scale + shift
            y = jnp.maximum(a * y, y)               # DynamicReLU
            if zero_pad_lanes and need_mask:
                y = y * mask                        # keep next layer's stats exact
            outs.append(y)
        return outs

    h = layer(xs, w1_ref, g1_ref, b1_ref, zero_pad_lanes=True)
    h = layer(h, w2_ref, g2_ref, b2_ref, zero_pad_lanes=True)
    h = layer(h, w3_ref, g3_ref, b3_ref, zero_pad_lanes=False)  # padded lanes sliced off

    # skip = nn.Identity(): residual add, lane-dense unmasked stores.
    for n in range(n_samples):
        o_ref[n] = (h[n] + xs[n]).astype(o_ref.dtype)


def rep_needle_block(x_nchw, params, epoch):
    """x_nchw: (N, C, H, W) float32.  params: dict (PyTorch Conv2d/BN layouts).
    epoch: Python int or scalar (does NOT force recompiles)."""
    n, c, hh, ww = x_nchw.shape
    l = hh * ww
    c_exp = params["w1"].shape[0]
    c_out = params["w3"].shape[0]
    assert c_out == c, "Identity skip requires in_channels == out_channels"

    # Lane axis padded to a multiple of 128 -> unmasked full-width vregs/stores.
    lp = ((l + 127) // 128) * 128

    # Free reshape (NCHW is contiguous): no host-side transpose / HBM copy.
    x3d = x_nchw.reshape(n, c, l)
    if lp != l:
        x3d = jnp.pad(x3d, ((0, 0), (0, 0), (0, lp - l)))  # zeros; only when needed

    # DynamicReLU.update_epoch(epoch): a = min(epoch, total)/total, as a traced
    # (1,1) SMEM scalar so epoch changes don't recompile the kernel.
    a_val = (jnp.minimum(jnp.asarray(epoch, jnp.float32), float(TOTAL_EPOCHS))
             / float(TOTAL_EPOCHS)).reshape(1, 1)

    # bf16 matmul inputs only when channel counts are large enough to be
    # MXU-bound; BN statistics/normalization stay f32 regardless.
    matmul_dtype = jnp.bfloat16 if min(c, c_exp) >= 64 else jnp.float32

    # VMEM budget keyed off the actual part (v7x has only 64 MiB / TensorCore).
    vmem_cap = 64 << 20  # conservative fallback
    try:
        info = pltpu.get_tpu_info()
        vmem_cap = int(getattr(info, "vmem_capacity_bytes", vmem_cap))
    except Exception:
        pass
    act_bytes = 4 * n * lp * (c + 2 * c_exp + c_out)          # x, h1, h2, out
    w_bytes = 4 * (c_exp * c + c_exp * c_exp + c_out * c_exp
                   + 2 * (2 * c_exp + c_out))                  # convs + BN affine
    budget = min(24 << 20, vmem_cap // 3)
    assert act_bytes + w_bytes <= budget, (
        "working set too large for the grid-less kernel on this part; "
        "needs the tiled two-sweep BN pipeline (see TODO)")
    vmem_limit = int(min(max(2 * act_bytes + w_bytes + (8 << 20), 32 << 20),
                         (3 * vmem_cap) // 4))

    cost = pl.CostEstimate(
        flops=2 * n * lp * (c * c_exp + c_exp * c_exp + c_exp * c_out)
              + 10 * n * lp * (2 * c_exp + c_out),
        transcendentals=2 * c_exp + c_out,                     # 3x per-channel rsqrt
        bytes_accessed=4 * n * lp * (c + c_out) + w_bytes + 4)

    smem = pl.BlockSpec(memory_space=pltpu.MemorySpace.SMEM)
    vmem = pl.BlockSpec(memory_space=pltpu.MemorySpace.VMEM)
    kernel = functools.partial(_rep_needle_kernel, n_samples=n, l_valid=l,
                               l_padded=lp, matmul_dtype=matmul_dtype)

    out3d = pl.pallas_call(
        kernel,
        out_shape=jax.ShapeDtypeStruct((n, c_out, lp), jnp.float32),
        in_specs=[smem] + [vmem] * 10,
        out_specs=vmem,
        compiler_params=pltpu.CompilerParams(vmem_limit_bytes=vmem_limit),
        cost_estimate=cost,
    )(a_val, x3d,
      params["w1"], params["g1"], params["b1"],
      params["w2"], params["g2"], params["b2"],
      params["w3"], params["g3"], params["b3"])

    if lp != l:
        out3d = out3d[:, :, :l]
    return out3d.reshape(n, c_out, hh, ww)   # free reshape back to NCHW


def init_params(key, in_channels, out_channels, expand_rate=2):
    """Deterministic synthetic init.  Conv weights kept in PyTorch Conv2d 1x1
    layout (C_out, C_in); BN gamma=1, beta=0 (PyTorch defaults), as (C,1)."""
    c_exp = in_channels * expand_rate
    k1, k2, k3 = jax.random.split(key, 3)

    def conv_w(k, cin, cout):
        bound = 1.0 / (cin ** 0.5)
        return jax.random.uniform(k, (cout, cin), jnp.float32, -bound, bound)

    return {
        "w1": conv_w(k1, in_channels, c_exp),
        "g1": jnp.ones((c_exp, 1), jnp.float32),
        "b1": jnp.zeros((c_exp, 1), jnp.float32),
        "w2": conv_w(k2, c_exp, c_exp),
        "g2": jnp.ones((c_exp, 1), jnp.float32),
        "b2": jnp.zeros((c_exp, 1), jnp.float32),
        "w3": conv_w(k3, c_exp, out_channels),
        "g3": jnp.ones((out_channels, 1), jnp.float32),
        "b3": jnp.zeros((out_channels, 1), jnp.float32),
    }


def _reference(x_nchw, params, epoch):
    """Pure-JAX reference of the PyTorch forward (training-mode BN)."""
    a = min(int(epoch), TOTAL_EPOCHS) / float(TOTAL_EPOCHS)

    def conv1x1(x, wt):  # wt: (Cout, Cin)
        return jnp.einsum('oi,nihw->nohw', wt, x)

    def bn(x, g, b):
        mean = jnp.mean(x, axis=(0, 2, 3), keepdims=True)
        var = jnp.mean((x - mean) ** 2, axis=(0, 2, 3), keepdims=True)
        return ((x - mean) * lax.rsqrt(var + BN_EPS)
                * g.reshape(1, -1, 1, 1) + b.reshape(1, -1, 1, 1))

    def drelu(x):
        return jnp.maximum(a * x, x)

    h = drelu(bn(conv1x1(x_nchw, params["w1"]), params["g1"], params["b1"]))
    h = drelu(bn(conv1x1(h, params["w2"]), params["g2"], params["b2"]))
    h = drelu(bn(conv1x1(h, params["w3"]), params["g3"], params["b3"]))
    return h + x_nchw


if __name__ == "__main__":
    key = jax.random.PRNGKey(0)
    kx1, kx2, kp = jax.random.split(key, 3)

    # Case 1: lane axis already a multiple of 128 (no padding, no mask).
    N, C, H, W = 2, 8, 16, 16            # H*W = 256
    epoch = 120                          # DynamicReLU slope a = 0.5
    params = init_params(kp, in_channels=C, out_channels=C, expand_rate=2)
    x1 = jax.random.normal(kx1, (N, C, H, W), dtype=jnp.float32)
    out1 = rep_needle_block(x1, params, epoch)
    jax.block_until_ready(out1)
    assert out1.shape == (N, C, H, W) and out1.dtype == jnp.float32
    err1 = float(jnp.max(jnp.abs(out1 - _reference(x1, params, epoch))))
    assert err1 < 1e-2, f"case1 mismatch vs reference: max abs err {err1}"

    # Case 2: H*W = 100 -> padded to 128; also exercises epoch clamping (a=1).
    H2, W2, epoch2 = 10, 10, 300
    x2 = jax.random.normal(kx2, (N, C, H2, W2), dtype=jnp.float32)
    out2 = rep_needle_block(x2, params, epoch2)
    jax.block_until_ready(out2)
    assert out2.shape == (N, C, H2, W2) and out2.dtype == jnp.float32
    err2 = float(jnp.max(jnp.abs(out2 - _reference(x2, params, epoch2))))
    assert err2 < 1e-2, f"case2 mismatch vs reference: max abs err {err2}"

    print("KERNEL_OK")
</pallas_src>

<mosaic_0001>
module attributes {stable_mosaic.version = 11 : i64} {
  func.func @_rep_needle_kernel(%arg0: memref<1x1xf32, #tpu.memory_space<smem>>, %arg1: memref<2x8x256xf32, #tpu.memory_space<vmem>>, %arg2: memref<16x8xf32, #tpu.memory_space<vmem>>, %arg3: memref<16x1xf32, #tpu.memory_space<vmem>>, %arg4: memref<16x1xf32, #tpu.memory_space<vmem>>, %arg5: memref<16x16xf32, #tpu.memory_space<vmem>>, %arg6: memref<16x1xf32, #tpu.memory_space<vmem>>, %arg7: memref<16x1xf32, #tpu.memory_space<vmem>>, %arg8: memref<8x16xf32, #tpu.memory_space<vmem>>, %arg9: memref<8x1xf32, #tpu.memory_space<vmem>>, %arg10: memref<8x1xf32, #tpu.memory_space<vmem>>, %arg11: memref<2x8x256xf32, #tpu.memory_space<vmem>>) attributes {dimension_semantics = [], scalar_prefetch = 0 : i64, scratch_operands = 0 : i64, tpu.core_type = #tpu.core_type<tc>} {
    %c0 = arith.constant 0 : index
    %c0_0 = arith.constant 0 : index
    %0 = memref.load %arg0[%c0, %c0_0] : memref<1x1xf32, #tpu.memory_space<smem>>
    %c0_1 = arith.constant 0 : index
    %c0_2 = arith.constant 0 : index
    %c0_3 = arith.constant 0 : index
    %1 = vector.load %arg1[%c0_1, %c0_2, %c0_3] : memref<2x8x256xf32, #tpu.memory_space<vmem>>, vector<1x8x256xf32>
    %2 = vector.shape_cast %1 : vector<1x8x256xf32> to vector<8x256xf32>
    %c1 = arith.constant 1 : index
    %c0_4 = arith.constant 0 : index
    %c0_5 = arith.constant 0 : index
    %3 = vector.load %arg1[%c1, %c0_4, %c0_5] : memref<2x8x256xf32, #tpu.memory_space<vmem>>, vector<1x8x256xf32>
    %4 = vector.shape_cast %3 : vector<1x8x256xf32> to vector<8x256xf32>
    %c0_6 = arith.constant 0 : index
    %c0_7 = arith.constant 0 : index
    %5 = vector.load %arg2[%c0_6, %c0_7] : memref<16x8xf32, #tpu.memory_space<vmem>>, vector<16x8xf32>
    %cst = arith.constant dense<0.000000e+00> : vector<16x256xf32>
    %6 = tpu.matmul %5, %2, %cst {dimension_numbers = #tpu.dot_dimension_numbers<[1], [0], [0], [1], [0, 0, 1, 1], [], []>} : vector<16x8xf32>, vector<8x256xf32>, vector<16x256xf32> -> vector<16x256xf32>
    %cst_8 = arith.constant dense<0.000000e+00> : vector<16x256xf32>
    %7 = tpu.matmul %5, %4, %cst_8 {dimension_numbers = #tpu.dot_dimension_numbers<[1], [0], [0], [1], [0, 0, 1, 1], [], []>} : vector<16x8xf32>, vector<8x256xf32>, vector<16x256xf32> -> vector<16x256xf32>
    %cst_9 = arith.constant dense<0.000000e+00> : vector<16xf32>
    %8 = vector.multi_reduction <add>, %6, %cst_9 [1] : vector<16x256xf32> to vector<16xf32>
    %9 = vector.shape_cast %8 : vector<16xf32> to vector<16x1xf32>
    %cst_10 = arith.constant 0.000000e+00 : f32
    %10 = vector.broadcast %cst_10 : f32 to vector<16x1xf32>
    %11 = arith.addf %10, %9 : vector<16x1xf32>
    %cst_11 = arith.constant dense<0.000000e+00> : vector<16xf32>
    %12 = vector.multi_reduction <add>, %7, %cst_11 [1] : vector<16x256xf32> to vector<16xf32>
    %13 = vector.shape_cast %12 : vector<16xf32> to vector<16x1xf32>
    %14 = arith.addf %11, %13 : vector<16x1xf32>
    %15 = arith.mulf %6, %6 : vector<16x256xf32>
    %cst_12 = arith.constant dense<0.000000e+00> : vector<16xf32>
    %16 = vector.multi_reduction <add>, %15, %cst_12 [1] : vector<16x256xf32> to vector<16xf32>
    %17 = vector.shape_cast %16 : vector<16xf32> to vector<16x1xf32>
    %cst_13 = arith.constant 0.000000e+00 : f32
    %18 = vector.broadcast %cst_13 : f32 to vector<16x1xf32>
    %19 = arith.addf %18, %17 : vector<16x1xf32>
    %20 = arith.mulf %7, %7 : vector<16x256xf32>
    %cst_14 = arith.constant dense<0.000000e+00> : vector<16xf32>
    %21 = vector.multi_reduction <add>, %20, %cst_14 [1] : vector<16x256xf32> to vector<16xf32>
    %22 = vector.shape_cast %21 : vector<16xf32> to vector<16x1xf32>
    %23 = arith.addf %19, %22 : vector<16x1xf32>
    %cst_15 = arith.constant 0.001953125 : f32
    %24 = vector.broadcast %cst_15 : f32 to vector<16x1xf32>
    %25 = arith.mulf %14, %24 : vector<16x1xf32>
    %cst_16 = arith.constant 0.001953125 : f32
    %26 = vector.broadcast %cst_16 : f32 to vector<16x1xf32>
    %27 = arith.mulf %23, %26 : vector<16x1xf32>
    %28 = arith.mulf %25, %25 : vector<16x1xf32>
    %29 = arith.subf %27, %28 : vector<16x1xf32>
    %cst_17 = arith.constant 0.000000e+00 : f32
    %30 = vector.broadcast %cst_17 : f32 to vector<16x1xf32>
    %31 = arith.maximumf %29, %30 : vector<16x1xf32>
    %c0_18 = arith.constant 0 : index
    %c0_19 = arith.constant 0 : index
    %32 = vector.load %arg3[%c0_18, %c0_19] : memref<16x1xf32, #tpu.memory_space<vmem>>, vector<16x1xf32>
    %cst_20 = arith.constant 9.99999974E-6 : f32
    %33 = vector.broadcast %cst_20 : f32 to vector<16x1xf32>
    %34 = arith.addf %31, %33 : vector<16x1xf32>
    %35 = math.rsqrt %34 : vector<16x1xf32>
    %36 = arith.mulf %32, %35 : vector<16x1xf32>
    %c0_21 = arith.constant 0 : index
    %c0_22 = arith.constant 0 : index
    %37 = vector.load %arg4[%c0_21, %c0_22] : memref<16x1xf32, #tpu.memory_space<vmem>>, vector<16x1xf32>
    %38 = arith.mulf %25, %36 : vector<16x1xf32>
    %39 = arith.subf %37, %38 : vector<16x1xf32>
    %40 = vector.broadcast %36 : vector<16x1xf32> to vector<16x256xf32>
    %41 = arith.mulf %6, %40 : vector<16x256xf32>
    %42 = vector.broadcast %39 : vector<16x1xf32> to vector<16x256xf32>
    %43 = arith.addf %41, %42 : vector<16x256xf32>
    %44 = vector.broadcast %0 : f32 to vector<16x256xf32>
    %45 = arith.mulf %44, %43 : vector<16x256xf32>
    %46 = arith.maximumf %45, %43 : vector<16x256xf32>
    %47 = vector.broadcast %36 : vector<16x1xf32> to vector<16x256xf32>
    %48 = arith.mulf %7, %47 : vector<16x256xf32>
    %49 = vector.broadcast %39 : vector<16x1xf32> to vector<16x256xf32>
    %50 = arith.addf %48, %49 : vector<16x256xf32>
    %51 = vector.broadcast %0 : f32 to vector<16x256xf32>
    %52 = arith.mulf %51, %50 : vector<16x256xf32>
    %53 = arith.maximumf %52, %50 : vector<16x256xf32>
    %c0_23 = arith.constant 0 : index
    %c0_24 = arith.constant 0 : index
    %54 = vector.load %arg5[%c0_23, %c0_24] : memref<16x16xf32, #tpu.memory_space<vmem>>, vector<16x16xf32>
    %cst_25 = arith.constant dense<0.000000e+00> : vector<16x256xf32>
    %55 = tpu.matmul %54, %46, %cst_25 {dimension_numbers = #tpu.dot_dimension_numbers<[1], [0], [0], [1], [0, 0, 1, 1], [], []>} : vector<16x16xf32>, vector<16x256xf32>, vector<16x256xf32> -> vector<16x256xf32>
    %cst_26 = arith.constant dense<0.000000e+00> : vector<16x256xf32>
    %56 = tpu.matmul %54, %53, %cst_26 {dimension_numbers = #tpu.dot_dimension_numbers<[1], [0], [0], [1], [0, 0, 1, 1], [], []>} : vector<16x16xf32>, vector<16x256xf32>, vector<16x256xf32> -> vector<16x256xf32>
    %cst_27 = arith.constant dense<0.000000e+00> : vector<16xf32>
    %57 = vector.multi_reduction <add>, %55, %cst_27 [1] : vector<16x256xf32> to vector<16xf32>
    %58 = vector.shape_cast %57 : vector<16xf32> to vector<16x1xf32>
    %cst_28 = arith.constant 0.000000e+00 : f32
    %59 = vector.broadcast %cst_28 : f32 to vector<16x1xf32>
    %60 = arith.addf %59, %58 : vector<16x1xf32>
    %cst_29 = arith.constant dense<0.000000e+00> : vector<16xf32>
    %61 = vector.multi_reduction <add>, %56, %cst_29 [1] : vector<16x256xf32> to vector<16xf32>
    %62 = vector.shape_cast %61 : vector<16xf32> to vector<16x1xf32>
    %63 = arith.addf %60, %62 : vector<16x1xf32>
    %64 = arith.mulf %55, %55 : vector<16x256xf32>
    %cst_30 = arith.constant dense<0.000000e+00> : vector<16xf32>
    %65 = vector.multi_reduction <add>, %64, %cst_30 [1] : vector<16x256xf32> to vector<16xf32>
    %66 = vector.shape_cast %65 : vector<16xf32> to vector<16x1xf32>
    %cst_31 = arith.constant 0.000000e+00 : f32
    %67 = vector.broadcast %cst_31 : f32 to vector<16x1xf32>
    %68 = arith.addf %67, %66 : vector<16x1xf32>
    %69 = arith.mulf %56, %56 : vector<16x256xf32>
    %cst_32 = arith.constant dense<0.000000e+00> : vector<16xf32>
    %70 = vector.multi_reduction <add>, %69, %cst_32 [1] : vector<16x256xf32> to vector<16xf32>
    %71 = vector.shape_cast %70 : vector<16xf32> to vector<16x1xf32>
    %72 = arith.addf %68, %71 : vector<16x1xf32>
    %cst_33 = arith.constant 0.001953125 : f32
    %73 = vector.broadcast %cst_33 : f32 to vector<16x1xf32>
    %74 = arith.mulf %63, %73 : vector<16x1xf32>
    %cst_34 = arith.constant 0.001953125 : f32
    %75 = vector.broadcast %cst_34 : f32 to vector<16x1xf32>
    %76 = arith.mulf %72, %75 : vector<16x1xf32>
    %77 = arith.mulf %74, %74 : vector<16x1xf32>
    %78 = arith.subf %76, %77 : vector<16x1xf32>
    %cst_35 = arith.constant 0.000000e+00 : f32
    %79 = vector.broadcast %cst_35 : f32 to vector<16x1xf32>
    %80 = arith.maximumf %78, %79 : vector<16x1xf32>
    %c0_36 = arith.constant 0 : index
    %c0_37 = arith.constant 0 : index
    %81 = vector.load %arg6[%c0_36, %c0_37] : memref<16x1xf32, #tpu.memory_space<vmem>>, vector<16x1xf32>
    %cst_38 = arith.constant 9.99999974E-6 : f32
    %82 = vector.broadcast %cst_38 : f32 to vector<16x1xf32>
    %83 = arith.addf %80, %82 : vector<16x1xf32>
    %84 = math.rsqrt %83 : vector<16x1xf32>
    %85 = arith.mulf %81, %84 : vector<16x1xf32>
    %c0_39 = arith.constant 0 : index
    %c0_40 = arith.constant 0 : index
    %86 = vector.load %arg7[%c0_39, %c0_40] : memref<16x1xf32, #tpu.memory_space<vmem>>, vector<16x1xf32>
    %87 = arith.mulf %74, %85 : vector<16x1xf32>
    %88 = arith.subf %86, %87 : vector<16x1xf32>
    %89 = vector.broadcast %85 : vector<16x1xf32> to vector<16x256xf32>
    %90 = arith.mulf %55, %89 : vector<16x256xf32>
    %91 = vector.broadcast %88 : vector<16x1xf32> to vector<16x256xf32>
    %92 = arith.addf %90, %91 : vector<16x256xf32>
    %93 = vector.broadcast %0 : f32 to vector<16x256xf32>
    %94 = arith.mulf %93, %92 : vector<16x256xf32>
    %95 = arith.maximumf %94, %92 : vector<16x256xf32>
    %96 = vector.broadcast %85 : vector<16x1xf32> to vector<16x256xf32>
    %97 = arith.mulf %56, %96 : vector<16x256xf32>
    %98 = vector.broadcast %88 : vector<16x1xf32> to vector<16x256xf32>
    %99 = arith.addf %97, %98 : vector<16x256xf32>
    %100 = vector.broadcast %0 : f32 to vector<16x256xf32>
    %101 = arith.mulf %100, %99 : vector<16x256xf32>
    %102 = arith.maximumf %101, %99 : vector<16x256xf32>
    %c0_41 = arith.constant 0 : index
    %c0_42 = arith.constant 0 : index
    %103 = vector.load %arg8[%c0_41, %c0_42] : memref<8x16xf32, #tpu.memory_space<vmem>>, vector<8x16xf32>
    %cst_43 = arith.constant dense<0.000000e+00> : vector<8x256xf32>
    %104 = tpu.matmul %103, %95, %cst_43 {dimension_numbers = #tpu.dot_dimension_numbers<[1], [0], [0], [1], [0, 0, 1, 1], [], []>} : vector<8x16xf32>, vector<16x256xf32>, vector<8x256xf32> -> vector<8x256xf32>
    %cst_44 = arith.constant dense<0.000000e+00> : vector<8x256xf32>
    %105 = tpu.matmul %103, %102, %cst_44 {dimension_numbers = #tpu.dot_dimension_numbers<[1], [0], [0], [1], [0, 0, 1, 1], [], []>} : vector<8x16xf32>, vector<16x256xf32>, vector<8x256xf32> -> vector<8x256xf32>
    %cst_45 = arith.constant dense<0.000000e+00> : vector<8xf32>
    %106 = vector.multi_reduction <add>, %104, %cst_45 [1] : vector<8x256xf32> to vector<8xf32>
    %107 = vector.shape_cast %106 : vector<8xf32> to vector<8x1xf32>
    %cst_46 = arith.constant 0.000000e+00 : f32
    %108 = vector.broadcast %cst_46 : f32 to vector<8x1xf32>
    %109 = arith.addf %108, %107 : vector<8x1xf32>
    %cst_47 = arith.constant dense<0.000000e+00> : vector<8xf32>
    %110 = vector.multi_reduction <add>, %105, %cst_47 [1] : vector<8x256xf32> to vector<8xf32>
    %111 = vector.shape_cast %110 : vector<8xf32> to vector<8x1xf32>
    %112 = arith.addf %109, %111 : vector<8x1xf32>
    %113 = arith.mulf %104, %104 : vector<8x256xf32>
    %cst_48 = arith.constant dense<0.000000e+00> : vector<8xf32>
    %114 = vector.multi_reduction <add>, %113, %cst_48 [1] : vector<8x256xf32> to vector<8xf32>
    %115 = vector.shape_cast %114 : vector<8xf32> to vector<8x1xf32>
    %cst_49 = arith.constant 0.000000e+00 : f32
    %116 = vector.broadcast %cst_49 : f32 to vector<8x1xf32>
    %117 = arith.addf %116, %115 : vector<8x1xf32>
    %118 = arith.mulf %105, %105 : vector<8x256xf32>
    %cst_50 = arith.constant dense<0.000000e+00> : vector<8xf32>
    %119 = vector.multi_reduction <add>, %118, %cst_50 [1] : vector<8x256xf32> to vector<8xf32>
    %120 = vector.shape_cast %119 : vector<8xf32> to vector<8x1xf32>
    %121 = arith.addf %117, %120 : vector<8x1xf32>
    %cst_51 = arith.constant 0.001953125 : f32
    %122 = vector.broadcast %cst_51 : f32 to vector<8x1xf32>
    %123 = arith.mulf %112, %122 : vector<8x1xf32>
    %cst_52 = arith.constant 0.001953125 : f32
    %124 = vector.broadcast %cst_52 : f32 to vector<8x1xf32>
    %125 = arith.mulf %121, %124 : vector<8x1xf32>
    %126 = arith.mulf %123, %123 : vector<8x1xf32>
    %127 = arith.subf %125, %126 : vector<8x1xf32>
    %cst_53 = arith.constant 0.000000e+00 : f32
    %128 = vector.broadcast %cst_53 : f32 to vector<8x1xf32>
    %129 = arith.maximumf %127, %128 : vector<8x1xf32>
    %c0_54 = arith.constant 0 : index
    %c0_55 = arith.constant 0 : index
    %130 = vector.load %arg9[%c0_54, %c0_55] : memref<8x1xf32, #tpu.memory_space<vmem>>, vector<8x1xf32>
    %cst_56 = arith.constant 9.99999974E-6 : f32
    %131 = vector.broadcast %cst_56 : f32 to vector<8x1xf32>
    %132 = arith.addf %129, %131 : vector<8x1xf32>
    %133 = math.rsqrt %132 : vector<8x1xf32>
    %134 = arith.mulf %130, %133 : vector<8x1xf32>
    %c0_57 = arith.constant 0 : index
    %c0_58 = arith.constant 0 : index
    %135 = vector.load %arg10[%c0_57, %c0_58] : memref<8x1xf32, #tpu.memory_space<vmem>>, vector<8x1xf32>
    %136 = arith.mulf %123, %134 : vector<8x1xf32>
    %137 = arith.subf %135, %136 : vector<8x1xf32>
    %138 = vector.broadcast %134 : vector<8x1xf32> to vector<8x256xf32>
    %139 = arith.mulf %104, %138 : vector<8x256xf32>
    %140 = vector.broadcast %137 : vector<8x1xf32> to vector<8x256xf32>
    %141 = arith.addf %139, %140 : vector<8x256xf32>
    %142 = vector.broadcast %0 : f32 to vector<8x256xf32>
    %143 = arith.mulf %142, %141 : vector<8x256xf32>
    %144 = arith.maximumf %143, %141 : vector<8x256xf32>
    %145 = vector.broadcast %134 : vector<8x1xf32> to vector<8x256xf32>
    %146 = arith.mulf %105, %145 : vector<8x256xf32>
    %147 = vector.broadcast %137 : vector<8x1xf32> to vector<8x256xf32>
    %148 = arith.addf %146, %147 : vector<8x256xf32>
    %149 = vector.broadcast %0 : f32 to vector<8x256xf32>
    %150 = arith.mulf %149, %148 : vector<8x256xf32>
    %151 = arith.maximumf %150, %148 : vector<8x256xf32>
    %152 = arith.addf %144, %2 : vector<8x256xf32>
    %c0_59 = arith.constant 0 : index
    %c0_60 = arith.constant 0 : index
    %c0_61 = arith.constant 0 : index
    %153 = vector.load %arg11[%c0_59, %c0_60, %c0_61] : memref<2x8x256xf32, #tpu.memory_space<vmem>>, vector<1x8x256xf32>
    %154 = vector.shape_cast %153 : vector<1x8x256xf32> to vector<8x256xf32>
    %155 = vector.shape_cast %152 : vector<8x256xf32> to vector<1x8x256xf32>
    tpu.vector_store %arg11[%c0_59, %c0_60, %c0_61], %155 {strides = array<i32>} : memref<2x8x256xf32, #tpu.memory_space<vmem>>, vector<1x8x256xf32>,
    %156 = arith.addf %151, %4 : vector<8x256xf32>
    %c1_62 = arith.constant 1 : index
    %c0_63 = arith.constant 0 : index
    %c0_64 = arith.constant 0 : index
    %157 = vector.load %arg11[%c1_62, %c0_63, %c0_64] : memref<2x8x256xf32, #tpu.memory_space<vmem>>, vector<1x8x256xf32>
    %158 = vector.shape_cast %157 : vector<1x8x256xf32> to vector<8x256xf32>
    %159 = vector.shape_cast %156 : vector<8x256xf32> to vector<1x8x256xf32>
    tpu.vector_store %arg11[%c1_62, %c0_63, %c0_64], %159 {strides = array<i32>} : memref<2x8x256xf32, #tpu.memory_space<vmem>>, vector<1x8x256xf32>,
    return
  }
}

</mosaic_0001>

<bundles_post_ra>
// kernel: tpu_custom_call.1
= control target key start
LH: loop header
LB: loop body
LE: loop exit
PB: predicated region body
PF: predicated region fallthrough
CT: control target
= control target key end

     0   :  { %vm48_vm0 = vcmask 64512   ;;  %v885_v3 = vmov 0.0   ;;  %s1167_s0 = inlined_call_operand.<no memory space> [shape: f32[1,1], index: 0, kind: input, shape index: {}]   ;;  %s1168_s1 = inlined_call_operand.vmem [shape: f32[2,8,256], index: 1, kind: input, shape index: {}]   ;;  %s1169_s2 = inlined_call_operand.vmem [shape: f32[16,8], index: 2, kind: input, shape index: {}]   ;;  %s1170_s3 = inlined_call_operand.vmem [shape: f32[16,1], index: 3, kind: input, shape index: {}]   ;;  %s1171_s4 = inlined_call_operand.vmem [shape: f32[16,1], index: 4, kind: input, shape index: {}]   ;;  %s1172_s5 = inlined_call_operand.vmem [shape: f32[16,16], index: 5, kind: input, shape index: {}]   ;;  %s1173_s6 = inlined_call_operand.vmem [shape: f32[16,1], index: 6, kind: input, shape index: {}]   ;;  %s1174_s7 = inlined_call_operand.vmem [shape: f32[16,1], index: 7, kind: input, shape index: {}]   ;;  %s1175_s8 = inlined_call_operand.vmem [shape: f32[8,16], index: 8, kind: input, shape index: {}]   ;;  %s1176_s9 = inlined_call_operand.vmem [shape: f32[8,1], index: 9, kind: input, shape index: {}]   ;;  %s1177_s10 = inlined_call_operand.vmem [shape: f32[8,1], index: 10, kind: input, shape index: {}]   ;;  %s1178_s11 = inlined_call_operand.hbm [shape: f32[2,8,256], index: 11, kind: output, shape index: {}]  }
   0x1   :  { %v953_v0 = vld [vmem:[%s1168_s1 + $0x8] sm:$0xff]  ;;  %v958_v1 = vld [vmem:[%s1168_s1] sm:$0xff]  ;;  %119 = vmatprep.mubr.f32.mxu0 %v885_v3  ;;  %v968_v4 = vld [vmem:[%s1168_s1 + $0x18] sm:$0xff] }
   0x2   :  { %v46_v2 = vld [vmem:[%s1169_s2] sm:$0xff]  ;;  %85 = vmatprep.subr.mxu0 %v953_v0  ;;  %v973_v5 = vld [vmem:[%s1168_s1 + $0x10] sm:$0xff]  ;;  %162 = vmatprep.subr.mxu1 %v968_v4 }
   0x3   :  { %86 = vmatpush1.msra.mxu0 %v958_v1 }
   0x4   :  { %17 = vsyncpa [#allocation4], 0  ;;  %836 = vmatmul.mubr.msk.f32.vlgmr.msra.gmra.mxu0 %vm48_vm0, %v46_v2  ;;  %163 = vmatpush1.msra.mxu1 %v973_v5  ;;  %v47_v6 = vld [vmem:[%s1169_s2 + $0x8] sm:$0xff]  ;;  %v886_v31 = vmov 0   ;;  %v259_v59 = vld [vmem:[%s1170_s3] sm:$0xff]  ;;  %vm328_vm1 = vcmask 130048  }
   0x5   :  { %196 = vmatprep.mubr.f32.mxu1 %v885_v3  ;;  %125 = vmatprep.mubr.f32.mxu0 %v885_v3  ;;  %v260_v56 = vld [vmem:[%s1170_s3 + $0x8] sm:$0xff] }
   0x6   :  { %838 = vmatmul.mubr.msk.f32.vlgmr.msra.gmra.mxu1 %vm48_vm0, %v46_v2  ;;  %851 = vset.pattern.permute.xlu0 %v886_v31  ;;  %v268_v63 = vld [vmem:[%s1171_s4 + $0x8] sm:$0xff] }
   0x7   :  { %202 = vmatprep.mubr.f32.mxu1 %v885_v3  ;;  %852 = vset.pattern.permute.xlu1 %v886_v31 }
   0x8   :  { %837 = vmatmul.mubr.msk.f32.gmra.mxu0 %vm48_vm0, %v47_v6 }
   0x9   :  { %399 = vmatprep.mubr.f32.mxu0 %v885_v3 }
   0xa   :  { %839 = vmatmul.mubr.msk.f32.gmra.mxu1 %vm48_vm0, %v47_v6 }
   0xb   :  { %476 = vmatprep.mubr.f32.mxu1 %v885_v3 }
  0xc4   :  { %v990_v7 = vpop.f32.mrf.mxu0 }
  0xc5   :  { %v225_v29 = vmul.f32 %v990_v7, %v990_v7 }
  0xc6   :  { %v992_v8 = vpop.f32.mrf.mxu0  ;;  %v994_v9 = vpop.f32.mrf.mxu1 }
  0xc7   :  { %v209_v10 = vadd.f32 %v992_v8, %v990_v7  ;;  %v237_v20 = vmul.f32 %v994_v9, %v994_v9  ;;  %v226_v28 = vmul.f32 %v992_v8, %v992_v8 }
  0xc8   :  { %v998_v11 = vpop.f32.mrf.mxu0  ;;  %v1000_v12 = vpop.f32.mrf.mxu1 }
  0xc9   :  { %210 = vadd.xlane.f32.xlu1 %v209_v10  ;;  %v217_v15 = vadd.f32 %v1000_v12, %v994_v9  ;;  %v238_v23 = vmul.f32 %v1000_v12, %v1000_v12  ;;  %v227_v25 = vmul.f32 %v998_v11, %v998_v11  ;;  %v229_v30 = vadd.f32 %v226_v28, %v225_v29  ;;  %v267_v10 = vld [vmem:[%s1171_s4] sm:$0xff] }
  0xca   :  { %v1002_v13 = vpop.f32.mrf.mxu0  ;;  %v1004_v14 = vpop.f32.mrf.mxu1 }
  0xcb   :  { %v212_v16 = vadd.f32 %v1002_v13, %v998_v11  ;;  %v239_v17 = vmul.f32 %v1004_v14, %v1004_v14  ;;  %v228_v24 = vmul.f32 %v1002_v13, %v1002_v13  ;;  %v241_v26 = vadd.f32 %v238_v23, %v237_v20 }
  0xcc   :  { %v1012_v18 = vpop.f32.mrf.mxu1  ;;  %v1049_v23 = vstv %s1167_s0 }
  0xcd   :  { %218 = vadd.xlane.f32.xlu1 %v217_v15  ;;  %213 = vadd.xlane.f32.xlu0 %v212_v16  ;;  %v240_v19 = vmul.f32 %v1012_v18, %v1012_v18  ;;  %v220_v22 = vadd.f32 %v1012_v18, %v1004_v14  ;;  %v232_v27 = vadd.f32 %v228_v24, %v227_v25 }
  0xcf   :  { %v244_v21 = vadd.f32 %v240_v19, %v239_v17 }
  0xd1   :  { %245 = vadd.xlane.f32.xlu1 %v244_v21  ;;  %221 = vadd.xlane.f32.xlu0 %v220_v22 }
  0xd5   :  { %242 = vadd.xlane.f32.xlu1 %v241_v26  ;;  %233 = vadd.xlane.f32.xlu0 %v232_v27 }
  0xd9   :  { %230 = vadd.xlane.f32.xlu0 %v229_v30 }
 0x152   :  { %v211_v32 = vpop.xlane.xlu1 %210 }
 0x156   :  { %v219_v33 = vpop.xlane.xlu1 %218  ;;  %v214_v34 = vpop.xlane.xlu0 %213 }
 0x157   :  { %v223_v38 = vadd.f32 %v219_v33, %v211_v32 }
 0x159   :  { %v249_v42 = vmul.f32 0.001953125, %v223_v38 }
 0x15a   :  { %v222_v35 = vpop.xlane.xlu0 %221  ;;  %v246_v37 = vpop.xlane.xlu1 %245 }
 0x15b   :  { %v224_v36 = vadd.f32 %v222_v35, %v214_v34  ;;  %v253_v49 = vmul.f32 %v249_v42, %v249_v42 }
 0x15d   :  { %v250_v39 = vmul.f32 0.001953125, %v224_v36 }
 0x15e   :  { %v234_v40 = vpop.xlane.xlu0 %233  ;;  %v243_v45 = vpop.xlane.xlu1 %242 }
 0x15f   :  { %v248_v41 = vadd.f32 %v246_v37, %v234_v40  ;;  %v254_v43 = vmul.f32 %v250_v39, %v250_v39 }
 0x161   :  { %v252_v44 = vmul.f32 0.001953125, %v248_v41 }
 0x162   :  { %v231_v46 = vpop.xlane.xlu0 %230 }
 0x163   :  { %v256_v47 = vsub.f32 %v252_v44, %v254_v43  ;;  %v247_v48 = vadd.f32 %v243_v45, %v231_v46  ;;  %v326_v46 = vld [vmem:[%s1172_s5] sm:$0xff] }
 0x165   :  { %v258_v50 = vmax.f32 %v256_v47, 0.0  ;;  %v251_v51 = vmul.f32 0.001953125, %v247_v48  ;;  %v327_v47 = vld [vmem:[%s1172_s5 + $0x8] sm:$0xff] }
 0x167   :  { %v262_v52 = vadd.f32 1e-05, %v258_v50  ;;  %v255_v53 = vsub.f32 %v251_v51, %v253_v49 }
 0x169   :  { %853 = vrsqrt.f32 %v262_v52  ;;  %v257_v54 = vmax.f32 %v255_v53, 0.0 }
 0x16b   :  { %v261_v55 = vadd.f32 1e-05, %v257_v54 }
 0x16d   :  { %855 = vrsqrt.f32 %v261_v55 }
 0x176   :  { %v854_v57 = vpop.eup %853 }
 0x177   :  { %v266_v58 = vmul.f32 %v854_v57, %v260_v56 }
 0x179   :  { %280 = vperm.xlu0 %851, %v266_v58   ;;  %v270_v62 = vmul.f32 %v266_v58, %v250_v39 }
 0x17a   :  { %v856_v60 = vpop.eup %855 }
 0x17b   :  { %v265_v61 = vmul.f32 %v856_v60, %v259_v59  ;;  %v272_v2 = vsub.f32 %v268_v63, %v270_v62 }
 0x17d   :  { %275 = vperm.xlu1 %852, %v265_v61   ;;  %v269_v6 = vmul.f32 %v265_v61, %v249_v42 }
 0x17f   :  { %v271_v15 = vsub.f32 %v267_v10, %v269_v6 }
 0x181   :  { %294 = vperm.xlu1 %852, %v272_v2  }
 0x185   :  { %289 = vperm.xlu1 %852, %v271_v15  }
 0x1f4   :  { %v281_v16 = vpop.permute.xlu0 %280 }
 0x1f5   :  { %v285_v19 = vmul.f32 %v281_v16, %v998_v11  ;;  %v286_v20 = vmul.f32 %v281_v16, %v1002_v13  ;;  %v312_v21 = vmul.f32 %v281_v16, %v1004_v14  ;;  %v313_v22 = vmul.f32 %v281_v16, %v1012_v18 }
 0x1f8   :  { %v276_v17 = vpop.permute.xlu1 %275 }
 0x1f9   :  { %v283_v29 = vmul.f32 %v276_v17, %v990_v7  ;;  %v284_v11 = vmul.f32 %v276_v17, %v992_v8  ;;  %v310_v13 = vmul.f32 %v276_v17, %v994_v9  ;;  %v311_v14 = vmul.f32 %v276_v17, %v1000_v12 }
 0x1fc   :  { %v295_v24 = vpop.permute.xlu1 %294 }
 0x1fd   :  { %v299_v25 = vadd.f32 %v295_v24, %v285_v19  ;;  %v300_v26 = vadd.f32 %v295_v24, %v286_v20  ;;  %v316_v27 = vadd.f32 %v312_v21, %v295_v24  ;;  %v317_v28 = vadd.f32 %v313_v22, %v295_v24 }
 0x1ff   :  { %v304_v18 = vmul.f32 %v1049_v23, %v299_v25  ;;  %v320_v30 = vmul.f32 %v316_v27, %v1049_v23  ;;  %v305_v31 = vmul.f32 %v1049_v23, %v300_v26  ;;  %v321_v32 = vmul.f32 %v317_v28, %v1049_v23 }
 0x200   :  { %v290_v33 = vpop.permute.xlu1 %289 }
 0x201   :  { %v297_v34 = vadd.f32 %v290_v33, %v283_v29  ;;  %v298_v35 = vadd.f32 %v290_v33, %v284_v11  ;;  %v314_v36 = vadd.f32 %v310_v13, %v290_v33  ;;  %v315_v37 = vadd.f32 %v311_v14, %v290_v33 }
 0x202   :  { %v309_v7 = vmax.f32 %v305_v31, %v300_v26  ;;  %v325_v38 = vmax.f32 %v321_v32, %v317_v28  ;;  %v308_v8 = vmax.f32 %v304_v18, %v299_v25  ;;  %v324_v39 = vmax.f32 %v320_v30, %v316_v27 }
 0x203   :  { %v302_v9 = vmul.f32 %v1049_v23, %v297_v34  ;;  %v318_v12 = vmul.f32 %v314_v36, %v1049_v23  ;;  %v303_v40 = vmul.f32 %v1049_v23, %v298_v35  ;;  %v319_v41 = vmul.f32 %v315_v37, %v1049_v23 }
 0x204   :  { %363 = vmatprep.subr.mxu0 %v309_v7  ;;  %440 = vmatprep.subr.mxu1 %v325_v38 }
 0x205   :  { %364 = vmatpush1.msra.mxu0 %v308_v8  ;;  %441 = vmatpush1.msra.mxu1 %v324_v39  ;;  %v307_v42 = vmax.f32 %v303_v40, %v298_v35  ;;  %v323_v43 = vmax.f32 %v319_v41, %v315_v37  ;;  %v306_v44 = vmax.f32 %v302_v9, %v297_v34  ;;  %v540_v39 = vld [vmem:[%s1173_s6 + $0x8] sm:$0xff]  ;;  %v539_v40 = vld [vmem:[%s1173_s6] sm:$0xff] }
 0x206   :  { %v322_v45 = vmax.f32 %v318_v12, %v314_v36 }
 0x207   :  { %365 = vmatprep.subr.mxu0 %v307_v42  ;;  %442 = vmatprep.subr.mxu1 %v323_v43 }
 0x208   :  { %366 = vmatpush1.msra.mxu0 %v306_v44  ;;  %443 = vmatpush1.msra.mxu1 %v322_v45  ;;  %v548_v44 = vld [vmem:[%s1174_s7 + $0x8] sm:$0xff]  ;;  %v547_v45 = vld [vmem:[%s1174_s7] sm:$0xff] }
 0x209   :  { %840 = vmatmul.mubr.msk.f32.vlgmr.msra.gmra.mxu0 %vm328_vm1, %v326_v46  ;;  %842 = vmatmul.mubr.msk.f32.vlgmr.msra.gmra.mxu1 %vm328_vm1, %v326_v46 }
 0x20a   :  { %482 = vmatprep.mubr.f32.mxu1 %v885_v3  ;;  %405 = vmatprep.mubr.f32.mxu0 %v885_v3 }
 0x20d   :  { %843 = vmatmul.mubr.msk.f32.gmra.mxu1 %vm328_vm1, %v327_v47  ;;  %841 = vmatmul.mubr.msk.f32.gmra.mxu0 %vm328_vm1, %v327_v47 }
 0x20e   :  { %673 = vmatprep.mubr.f32.mxu0 %v885_v3  ;;  %744 = vmatprep.mubr.f32.mxu1 %v885_v3 }
 0x2c9   :  { %v1077_v48 = vpop.f32.mrf.mxu0  ;;  %v1079_v49 = vpop.f32.mrf.mxu1 }
 0x2ca   :  { %v505_v59 = vmul.f32 %v1077_v48, %v1077_v48  ;;  %v517_v16 = vmul.f32 %v1079_v49, %v1079_v49 }
 0x2cb   :  { %v1081_v50 = vpop.f32.mrf.mxu0  ;;  %v1083_v51 = vpop.f32.mrf.mxu1 }
 0x2cc   :  { %v489_v52 = vadd.f32 %v1081_v50, %v1077_v48  ;;  %v497_v56 = vadd.f32 %v1083_v51, %v1079_v49  ;;  %v506_v57 = vmul.f32 %v1081_v50, %v1081_v50  ;;  %v518_v17 = vmul.f32 %v1083_v51, %v1083_v51 }
 0x2cd   :  { %v1087_v53 = vpop.f32.mrf.mxu1  ;;  %v1089_v54 = vpop.f32.mrf.mxu0 }
 0x2ce   :  { %490 = vadd.xlane.f32.xlu1 %v489_v52  ;;  %v509_v60 = vadd.f32 %v506_v57, %v505_v59  ;;  %v507_v62 = vmul.f32 %v1089_v54, %v1089_v54  ;;  %v519_v6 = vmul.f32 %v1087_v53, %v1087_v53  ;;  %v521_v19 = vadd.f32 %v518_v17, %v517_v16 }
 0x2cf   :  { %v1091_v55 = vpop.f32.mrf.mxu1  ;;  %v1099_v58 = vpop.f32.mrf.mxu0 }
 0x2d0   :  { %v500_v3 = vadd.f32 %v1091_v55, %v1087_v53  ;;  %v492_v61 = vadd.f32 %v1099_v58, %v1089_v54  ;;  %v508_v63 = vmul.f32 %v1099_v58, %v1099_v58  ;;  %v520_v10 = vmul.f32 %v1091_v55, %v1091_v55 }
 0x2d2   :  { %501 = vadd.xlane.f32.xlu0 %v500_v3  ;;  %498 = vadd.xlane.f32.xlu1 %v497_v56  ;;  %v512_v2 = vadd.f32 %v508_v63, %v507_v62  ;;  %v524_v15 = vadd.f32 %v520_v10, %v519_v6 }
 0x2d6   :  { %510 = vadd.xlane.f32.xlu0 %v509_v60  ;;  %493 = vadd.xlane.f32.xlu1 %v492_v61 }
 0x2da   :  { %513 = vadd.xlane.f32.xlu1 %v512_v2 }
 0x2de   :  { %525 = vadd.xlane.f32.xlu1 %v524_v15 }
 0x2e2   :  { %522 = vadd.xlane.f32.xlu1 %v521_v19 }
 0x357   :  { %v491_v20 = vpop.xlane.xlu1 %490 }
 0x35b   :  { %v499_v21 = vpop.xlane.xlu1 %498  ;;  %v502_v24 = vpop.xlane.xlu0 %501 }
 0x35c   :  { %v503_v27 = vadd.f32 %v499_v21, %v491_v20 }
 0x35e   :  { %v529_v13 = vmul.f32 0.001953125, %v503_v27 }
 0x35f   :  { %v494_v22 = vpop.xlane.xlu1 %493  ;;  %v511_v30 = vpop.xlane.xlu0 %510 }
 0x360   :  { %v504_v25 = vadd.f32 %v502_v24, %v494_v22  ;;  %v533_v34 = vmul.f32 %v529_v13, %v529_v13 }
 0x362   :  { %v530_v28 = vmul.f32 0.001953125, %v504_v25 }
 0x363   :  { %v514_v26 = vpop.xlane.xlu1 %513 }
 0x364   :  { %v534_v14 = vmul.f32 %v530_v28, %v530_v28 }
 0x367   :  { %v526_v29 = vpop.xlane.xlu1 %525 }
 0x368   :  { %v528_v11 = vadd.f32 %v526_v29, %v514_v26 }
 0x36a   :  { %v532_v18 = vmul.f32 0.001953125, %v528_v11 }
 0x36b   :  { %v523_v31 = vpop.xlane.xlu1 %522 }
 0x36c   :  { %v536_v32 = vsub.f32 %v532_v18, %v534_v14  ;;  %v527_v33 = vadd.f32 %v523_v31, %v511_v30  ;;  %v605_v30 = vld [vmem:[%s1175_s8] sm:$0xff] }
 0x36e   :  { %v538_v35 = vmax.f32 %v536_v32, 0.0  ;;  %v531_v36 = vmul.f32 0.001953125, %v527_v33 }
 0x370   :  { %v542_v37 = vadd.f32 1e-05, %v538_v35  ;;  %v535_v7 = vsub.f32 %v531_v36, %v533_v34 }
 0x372   :  { %857 = vrsqrt.f32 %v542_v37  ;;  %v537_v38 = vmax.f32 %v535_v7, 0.0 }
 0x374   :  { %v541_v8 = vadd.f32 1e-05, %v537_v38 }
 0x376   :  { %859 = vrsqrt.f32 %v541_v8 }
 0x37f   :  { %v858_v9 = vpop.eup %857 }
 0x380   :  { %v546_v12 = vmul.f32 %v858_v9, %v540_v39 }
 0x382   :  { %560 = vperm.xlu0 %851, %v546_v12   ;;  %v550_v43 = vmul.f32 %v546_v12, %v530_v28 }
 0x383   :  { %v860_v41 = vpop.eup %859 }
 0x384   :  { %v545_v42 = vmul.f32 %v860_v41, %v539_v40  ;;  %v552_v47 = vsub.f32 %v548_v44, %v550_v43 }
 0x386   :  { %555 = vperm.xlu1 %852, %v545_v42   ;;  %v549_v46 = vmul.f32 %v545_v42, %v529_v13 }
 0x388   :  { %v551_v52 = vsub.f32 %v547_v45, %v549_v46 }
 0x38a   :  { %574 = vperm.xlu1 %852, %v552_v47   ;;  %569 = vperm.xlu0 %851, %v551_v52  }
 0x3fd   :  { %v561_v3 = vpop.permute.xlu0 %560 }
 0x3fe   :  { %v565_v57 = vmul.f32 %v561_v3, %v1089_v54  ;;  %v566_v59 = vmul.f32 %v561_v3, %v1099_v58  ;;  %v591_v60 = vmul.f32 %v561_v3, %v1087_v53  ;;  %v592_v61 = vmul.f32 %v561_v3, %v1091_v55 }
 0x401   :  { %v556_v56 = vpop.permute.xlu1 %555 }
 0x402   :  { %v563_v62 = vmul.f32 %v556_v56, %v1077_v48  ;;  %v564_v63 = vmul.f32 %v556_v56, %v1081_v50  ;;  %v589_v2 = vmul.f32 %v556_v56, %v1079_v49  ;;  %v590_v6 = vmul.f32 %v556_v56, %v1083_v51 }
 0x405   :  { %v575_v10 = vpop.permute.xlu1 %574  ;;  %v570_v15 = vpop.permute.xlu0 %569 }
 0x406   :  { %v579_v16 = vadd.f32 %v575_v10, %v565_v57  ;;  %v580_v17 = vadd.f32 %v575_v10, %v566_v59  ;;  %v595_v19 = vadd.f32 %v591_v60, %v575_v10  ;;  %v596_v54 = vadd.f32 %v592_v61, %v575_v10  ;;  %v776_v57 = vld [vmem:[%s1176_s9] sm:$0xff]  ;;  %s887_s9 = smov [#allocation3]  }
 0x407   :  { %v577_v20 = vadd.f32 %v570_v15, %v563_v62  ;;  %v578_v58 = vadd.f32 %v570_v15, %v564_v63  ;;  %v593_v21 = vadd.f32 %v589_v2, %v570_v15  ;;  %v594_v53 = vadd.f32 %v590_v6, %v570_v15  ;;  %v780_v61 = vld [vmem:[%s1177_s10] sm:$0xff]  ;;  %s823_s10 = sshll.u32 %s887_s9, 4  ;;  %s824_s10 = int_to_ptr.vmem [resolvable:$true] %s823_s10 }
 0x408   :  { %v583_v55 = vmul.f32 %v579_v16, %v1049_v23  ;;  %v599_v48 = vmul.f32 %v595_v19, %v1049_v23  ;;  %v584_v50 = vmul.f32 %v580_v17, %v1049_v23  ;;  %v600_v49 = vmul.f32 %v596_v54, %v1049_v23  ;;  %s863_s1 = scalar_lea.vmem %s824_s10, 512  ;;  %p868_p1 = scmp.lt.s32.totalorder %s824_s10, %s824_s10 }
 0x409   :  { %v581_v51 = vmul.f32 %v577_v20, %v1049_v23  ;;  %v597_v22 = vmul.f32 %v593_v21, %v1049_v23  ;;  %v582_v24 = vmul.f32 %v578_v58, %v1049_v23  ;;  %v598_v25 = vmul.f32 %v594_v53, %v1049_v23  ;;  %p864_p0 = scmp.ne.s32.totalorder %s824_s10, %s863_s1  ;;  %p869_p2 = scmp.lt.s32.totalorder %s863_s1, %s863_s1 }
 0x40a   :  { %v588_v26 = vmax.f32 %v584_v50, %v580_v17  ;;  %v604_v27 = vmax.f32 %v600_v49, %v596_v54  ;;  %v587_v28 = vmax.f32 %v583_v55, %v579_v16  ;;  %v603_v29 = vmax.f32 %v599_v48, %v595_v19 }
 0x40b   :  { %v586_v11 = vmax.f32 %v582_v24, %v578_v58  ;;  %v602_v13 = vmax.f32 %v598_v25, %v594_v53  ;;  %v585_v14 = vmax.f32 %v581_v51, %v577_v20  ;;  %v601_v18 = vmax.f32 %v597_v22, %v593_v21  ;;  %p870_p3 = por %p869_p2, %p868_p1 }
 0x40c   :  { %637 = vmatprep.subr.mxu0 %v588_v26  ;;  %708 = vmatprep.subr.mxu1 %v604_v27 }
 0x40d   :  { %638 = vmatpush1.msra.mxu0 %v587_v28  ;;  %709 = vmatpush1.msra.mxu1 %v603_v29  ;;  %p871_p4 = pnand %p870_p3, %p864_p0 }
 0x40e   :  { %639 = vmatprep.subr.mxu0 %v586_v11  ;;  %710 = vmatprep.subr.mxu1 %v602_v13 }
 0x40f   :  { %640 = vmatpush1.msra.mxu0 %v585_v14  ;;  %711 = vmatpush1.msra.mxu1 %v601_v18 }
 0x410   :  { %844 = vmatmul.mubr.msk.f32.vlgmr.msra.gmra.mxu0 %vm328_vm1, %v605_v30  ;;  %845 = vmatmul.mubr.msk.f32.vlgmr.msra.gmra.mxu1 %vm328_vm1, %v605_v30 }
 0x4d0   :  { %v675_v31 = vpop.f32.mrf.mxu0  ;;  %v746_v32 = vpop.f32.mrf.mxu1 }
 0x4d1   :  { %v765_v38 = vmul.f32 %v746_v32, %v746_v32  ;;  %v759_v8 = vmul.f32 %v675_v31, %v675_v31 }
 0x4d2   :  { %v677_v33 = vpop.f32.mrf.mxu0  ;;  %v748_v34 = vpop.f32.mrf.mxu1 }
 0x4d3   :  { %v760_v35 = vmul.f32 %v677_v33, %v677_v33  ;;  %v766_v36 = vmul.f32 %v748_v34, %v748_v34  ;;  %v751_v37 = vadd.f32 %v677_v33, %v675_v31  ;;  %v755_v7 = vadd.f32 %v748_v34, %v746_v32 }
 0x4d5   :  { %752 = vadd.xlane.f32.xlu1 %v751_v37  ;;  %756 = vadd.xlane.f32.xlu0 %v755_v7  ;;  %v767_v39 = vadd.f32 %v766_v36, %v765_v38  ;;  %v761_v9 = vadd.f32 %v760_v35, %v759_v8 }
 0x4d9   :  { %768 = vadd.xlane.f32.xlu1 %v767_v39  ;;  %762 = vadd.xlane.f32.xlu0 %v761_v9 }
 0x55e   :  { %v753_v12 = vpop.xlane.xlu1 %752  ;;  %v757_v40 = vpop.xlane.xlu0 %756 }
 0x55f   :  { %v758_v41 = vadd.f32 %v757_v40, %v753_v12 }
 0x561   :  { %v771_v42 = vmul.f32 0.001953125, %v758_v41 }
 0x562   :  { %v769_v43 = vpop.xlane.xlu1 %768  ;;  %v763_v44 = vpop.xlane.xlu0 %762 }
 0x563   :  { %v770_v45 = vadd.f32 %v769_v43, %v763_v44  ;;  %v773_v46 = vmul.f32 %v771_v42, %v771_v42 }
 0x565   :  { %v772_v47 = vmul.f32 0.001953125, %v770_v45 }
 0x567   :  { %v774_v52 = vsub.f32 %v772_v47, %v773_v46 }
 0x569   :  { %v775_v3 = vmax.f32 %v774_v52, 0.0 }
 0x56b   :  { %v777_v56 = vadd.f32 1e-05, %v775_v3 }
 0x56d   :  { %861 = vrsqrt.f32 %v777_v56 }
 0x57a   :  { %v862_v59 = vpop.eup %861 }
 0x57b   :  { %v779_v60 = vmul.f32 %v862_v59, %v776_v57 }
 0x57d   :  { %785 = vperm.xlu0 %851, %v779_v60   ;;  %v781_v62 = vmul.f32 %v779_v60, %v771_v42 }
 0x57f   :  { %v782_v63 = vsub.f32 %v780_v61, %v781_v62 }
 0x581   :  { %792 = vperm.xlu1 %852, %v782_v63  }
 0x5f8   :  { %v786_v2 = vpop.permute.xlu0 %785 }
 0x5f9   :  { %v788_v6 = vmul.f32 %v786_v2, %v675_v31  ;;  %v789_v10 = vmul.f32 %v786_v2, %v677_v33  ;;  %v801_v15 = vmul.f32 %v786_v2, %v746_v32  ;;  %v802_v16 = vmul.f32 %v786_v2, %v748_v34 }
 0x5fc   :  { %v793_v17 = vpop.permute.xlu1 %792 }
 0x5fd   :  { %v795_v19 = vadd.f32 %v793_v17, %v788_v6  ;;  %v796_v54 = vadd.f32 %v793_v17, %v789_v10  ;;  %v803_v20 = vadd.f32 %v801_v15, %v793_v17  ;;  %v804_v58 = vadd.f32 %v802_v16, %v793_v17 }
 0x5ff   :  { %v797_v21 = vmul.f32 %v795_v19, %v1049_v23  ;;  %v798_v53 = vmul.f32 %v796_v54, %v1049_v23  ;;  %v805_v55 = vmul.f32 %v803_v20, %v1049_v23  ;;  %v806_v48 = vmul.f32 %v804_v58, %v1049_v23 }
 0x601   :  { %v799_v50 = vmax.f32 %v797_v21, %v795_v19  ;;  %v800_v49 = vmax.f32 %v798_v53, %v796_v54  ;;  %v807_v51 = vmax.f32 %v805_v55, %v803_v20  ;;  %v808_v22 = vmax.f32 %v806_v48, %v804_v58 }
 0x603   :  { %v809_v24 = vadd.f32 %v799_v50, %v958_v1  ;;  %v810_v25 = vadd.f32 %v800_v49, %v953_v0  ;;  %v813_v26 = vadd.f32 %v973_v5, %v807_v51  ;;  %v814_v27 = vadd.f32 %v968_v4, %v808_v22 }
 0x605   :  { %811 = vst [vmem:[#allocation3] sm:$0xff] %v809_v24  ;;  %812 = vst [vmem:[#allocation3 + $0x8] sm:$0xff] %v810_v25 }
 0x606   :  { %816 = vst [vmem:[#allocation3 + $0x10] sm:$0xff] %v813_v26  ;;  %817 = vst [vmem:[#allocation3 + $0x18] sm:$0xff] %v814_v27 }
 0x607   :  { %874 = shalt.err (!%p871_p4)
}
 0x608   :  { %s888_s2 = smov 256   ;;  %s889_s29 = smov 16  }
 0x609   :  { %829 = dma.vmem_to_hbm [thread:$0]  %s824_s10, 512, %s1178_s11, [#allocation4], %s888_s2, %s888_s2, %s889_s29  }
 0x60a   :  { %883 = dma.done.wait [#allocation4], 512  }
 0x60b   :  { %884 = vsyncadd [#allocation4], 4294966784 }
 0x60c   :  { %833 = vsyncpa [#allocation4], 1 }

</bundles_post_ra>
